<compile_context>
chip_gen: v6e
topology: v6e:2x2x1
jax: 0.10.0
libtpu: 0.0.40
codegen_flags: <defaults>
</compile_context>

<pallas_src>
import jax
import jax.numpy as jnp
from jax.experimental import pallas as pl
from jax.experimental.pallas import tpu as pltpu

_LANE = 128   # lane width (last dim)
_SUBLANE = 8  # sublane width (second-to-last dim)


def _round_up(n, m):
    return ((n + m - 1) // m) * m


def _linear_kernel(x_ref, w_ref, b_ref, o_ref):
    # y = x @ W_t + b   where W_t is already [in, out] (pre-transposed).
    x = x_ref[...]                      # [B_pad, in_pad]
    w = w_ref[...]                      # [in_pad, out_pad]
    b = b_ref[...]                      # [1, out_pad]
    acc = jnp.dot(x, w, preferred_element_type=jnp.float32)   # MXU, [B_pad, out_pad]
    o_ref[...] = (acc + b).astype(o_ref.dtype)


def linear_forward(x, weight, bias):
    """Pallas equivalent of Model.forward: Sequential(Linear)(x).

    x:      [B, in_dim]
    weight: [out_dim, in_dim]   (PyTorch nn.Linear layout)
    bias:   [out_dim]
    returns [B, out_dim]
    """
    B, in_dim = x.shape
    out_dim, in_dim_w = weight.shape
    assert in_dim == in_dim_w

    # Lane-dense padded shapes (zero padding keeps the math exact).
    b_pad = _round_up(B, _SUBLANE)
    in_pad = _round_up(in_dim, _LANE)
    out_pad = _round_up(out_dim, _LANE)

    x_p = jnp.zeros((b_pad, in_pad), x.dtype).at[:B, :in_dim].set(x)
    # Pre-transpose the weight in the wrapper (one-time layout plumbing);
    # kernel never runs an XLU transpose.
    w_t = jnp.zeros((in_pad, out_pad), weight.dtype).at[:in_dim, :out_dim].set(weight.T)
    b_p = jnp.zeros((1, out_pad), bias.dtype).at[0, :out_dim].set(bias)

    y_pad = pl.pallas_call(
        _linear_kernel,
        out_shape=jax.ShapeDtypeStruct((b_pad, out_pad), x.dtype),
        in_specs=[
            pl.BlockSpec(memory_space=pltpu.MemorySpace.VMEM),
            pl.BlockSpec(memory_space=pltpu.MemorySpace.VMEM),
            pl.BlockSpec(memory_space=pltpu.MemorySpace.VMEM),
        ],
        out_specs=pl.BlockSpec(memory_space=pltpu.MemorySpace.VMEM),
    )(x_p, w_t, b_p)

    return y_pad[:B, :out_dim]


if __name__ == "__main__":
    # Small shapes implied by the forward: x: [batch, input_dim]
    batch, input_dim, output_dim = 8, 32, 16

    key = jax.random.PRNGKey(0)
    kx, kw, kb = jax.random.split(key, 3)

    x = jax.random.normal(kx, (batch, input_dim), dtype=jnp.float32)
    # Deterministic parameter init (uniform like PyTorch's default Linear init)
    bound = 1.0 / (input_dim ** 0.5)
    weight = jax.random.uniform(kw, (output_dim, input_dim),
                                minval=-bound, maxval=bound, dtype=jnp.float32)
    bias = jax.random.uniform(kb, (output_dim,),
                              minval=-bound, maxval=bound, dtype=jnp.float32)

    fwd = jax.jit(linear_forward)
    y = fwd(x, weight, bias)
    y = jax.block_until_ready(y)

    # Reference check in plain JAX.
    y_ref = x @ weight.T + bias
    assert y.shape == (batch, output_dim)
    assert jnp.allclose(y, y_ref, atol=1e-5, rtol=1e-5)

    print("KERNEL_OK")
</pallas_src>

<mosaic_0001>
module attributes {stable_mosaic.version = 11 : i64} {
  func.func @_linear_kernel(%arg0: memref<8x128xf32, #tpu.memory_space<vmem>>, %arg1: memref<128x128xf32, #tpu.memory_space<vmem>>, %arg2: memref<1x128xf32, #tpu.memory_space<vmem>>, %arg3: memref<8x128xf32, #tpu.memory_space<vmem>>) attributes {dimension_semantics = [], scalar_prefetch = 0 : i64, scratch_operands = 0 : i64, tpu.core_type = #tpu.core_type<tc>} {
    %c0 = arith.constant 0 : index
    %c0_0 = arith.constant 0 : index
    %0 = vector.load %arg0[%c0, %c0_0] : memref<8x128xf32, #tpu.memory_space<vmem>>, vector<8x128xf32>
    %c0_1 = arith.constant 0 : index
    %c0_2 = arith.constant 0 : index
    %1 = vector.load %arg1[%c0_1, %c0_2] : memref<128x128xf32, #tpu.memory_space<vmem>>, vector<128x128xf32>
    %c0_3 = arith.constant 0 : index
    %c0_4 = arith.constant 0 : index
    %2 = vector.load %arg2[%c0_3, %c0_4] : memref<1x128xf32, #tpu.memory_space<vmem>>, vector<1x128xf32>
    %cst = arith.constant dense<0.000000e+00> : vector<8x128xf32>
    %3 = tpu.matmul %0, %1, %cst {dimension_numbers = #tpu.dot_dimension_numbers<[1], [0], [0], [1], [0, 0, 1, 1], [], []>} : vector<8x128xf32>, vector<128x128xf32>, vector<8x128xf32> -> vector<8x128xf32>
    %4 = vector.broadcast %2 : vector<1x128xf32> to vector<8x128xf32>
    %5 = arith.addf %3, %4 : vector<8x128xf32>
    %c0_5 = arith.constant 0 : index
    %c0_6 = arith.constant 0 : index
    %6 = vector.load %arg3[%c0_5, %c0_6] : memref<8x128xf32, #tpu.memory_space<vmem>>, vector<8x128xf32>
    tpu.vector_store %arg3[%c0_5, %c0_6], %5 {strides = array<i32>} : memref<8x128xf32, #tpu.memory_space<vmem>>, vector<8x128xf32>,
    return
  }
}

</mosaic_0001>

<bundles_post_ra>
// kernel: linear_forward.1
= control target key start
LH: loop header
LB: loop body
LE: loop exit
PB: predicated region body
PF: predicated region fallthrough
CT: control target
= control target key end

     0   :  { %v202_v1 = vmov 0.0   ;;  %vm203_vm0 = vmmov 0   ;;  %s282_s0 = inlined_call_operand.vmem [shape: f32[8,128], index: 0, kind: input, shape index: {}]   ;;  %s283_s1 = inlined_call_operand.vmem [shape: f32[128,128], index: 1, kind: input, shape index: {}]   ;;  %s284_s2 = inlined_call_operand.vmem [shape: f32[1,128], index: 2, kind: input, shape index: {}]   ;;  %s285_s3 = inlined_call_operand.hbm [shape: f32[8,128], index: 3, kind: output, shape index: {}]  }
   0x1   :  { %v31_v0 = vld [vmem:[%s283_s1 + $0x78] sm:$0xff]  ;;  %142 = vmatprep.subr.mxu0 %v202_v1  ;;  %v30_v2 = vld [vmem:[%s283_s1 + $0x70] sm:$0xff]  ;;  %174 = vmatprep.mubr.msk.f32.mxu0 %vm203_vm0, %v202_v1  ;;  %v29_v3 = vld [vmem:[%s283_s1 + $0x68] sm:$0xff] }
   0x2   :  { %143 = vmatpush3.msra.mxu0 %v31_v0  ;;  %v28_v4 = vld [vmem:[%s283_s1 + $0x60] sm:$0xff] }
   0x3   :  { %144 = vmatprep.subr.mxu0 %v202_v1 }
   0x4   :  { %145 = vmatpush3.msra.mxu0 %v30_v2 }
   0x5   :  { %146 = vmatprep.subr.mxu0 %v202_v1 }
   0x6   :  { %147 = vmatpush3.msra.mxu0 %v29_v3 }
   0x7   :  { %8 = vsyncpa [#allocation3], 0  ;;  %148 = vmatprep.subr.mxu0 %v202_v1  ;;  %v27_v5 = vld [vmem:[%s283_s1 + $0x58] sm:$0xff]  ;;  %v26_v6 = vld [vmem:[%s283_s1 + $0x50] sm:$0xff]  ;;  %s204_s21 = smov [#allocation2]  }
   0x8   :  { %149 = vmatpush3.msra.mxu0 %v28_v4  ;;  %v25_v7 = vld [vmem:[%s283_s1 + $0x48] sm:$0xff]  ;;  %v24_v8 = vld [vmem:[%s283_s1 + $0x40] sm:$0xff]  ;;  %v23_v9 = vld [vmem:[%s283_s1 + $0x38] sm:$0xff]  ;;  %s116_s22 = sshll.u32 %s204_s21, 4  ;;  %s117_s22 = int_to_ptr.vmem [resolvable:$true] %s116_s22 }
   0x9   :  { %150 = vmatprep.subr.mxu0 %v202_v1  ;;  %v22_v10 = vld [vmem:[%s283_s1 + $0x30] sm:$0xff]  ;;  %v21_v11 = vld [vmem:[%s283_s1 + $0x28] sm:$0xff]  ;;  %v20_v12 = vld [vmem:[%s283_s1 + $0x20] sm:$0xff]  ;;  %p185_p1 = scmp.lt.s32.totalorder %s117_s22, %s117_s22 }
   0xa   :  { %151 = vmatpush3.msra.mxu0 %v27_v5  ;;  %v19_v13 = vld [vmem:[%s283_s1 + $0x18] sm:$0xff]  ;;  %v18_v14 = vld [vmem:[%s283_s1 + $0x10] sm:$0xff]  ;;  %v17_v15 = vld [vmem:[%s283_s1 + $0x8] sm:$0xff] }
   0xb   :  { %152 = vmatprep.subr.mxu0 %v202_v1  ;;  %v16_v16 = vld [vmem:[%s283_s1] sm:$0xff]  ;;  %s180_s1 = scalar_lea.vmem %s117_s22, 128 }
   0xc   :  { %153 = vmatpush3.msra.mxu0 %v26_v6  ;;  %v15_v17 = vld [vmem:[%s282_s0] sm:$0xff]  ;;  %p181_p0 = scmp.ne.s32.totalorder %s117_s22, %s180_s1  ;;  %p186_p2 = scmp.lt.s32.totalorder %s180_s1, %s180_s1 }
   0xd   :  { %154 = vmatprep.subr.mxu0 %v202_v1  ;;  %v124_v18 = vld [vmem:[%s284_s2] ss:$0 sm:$0xff] }
   0xe   :  { %155 = vmatpush3.msra.mxu0 %v25_v7  ;;  %p187_p3 = por %p186_p2, %p185_p1 }
   0xf   :  { %156 = vmatprep.subr.mxu0 %v202_v1 }
  0x10   :  { %157 = vmatpush3.msra.mxu0 %v24_v8  ;;  %p188_p4 = pnand %p187_p3, %p181_p0 }
  0x11   :  { %158 = vmatprep.subr.mxu0 %v202_v1 }
  0x12   :  { %159 = vmatpush3.msra.mxu0 %v23_v9 }
  0x13   :  { %160 = vmatprep.subr.mxu0 %v202_v1 }
  0x14   :  { %161 = vmatpush3.msra.mxu0 %v22_v10 }
  0x15   :  { %162 = vmatprep.subr.mxu0 %v202_v1 }
  0x16   :  { %163 = vmatpush3.msra.mxu0 %v21_v11 }
  0x17   :  { %164 = vmatprep.subr.mxu0 %v202_v1 }
  0x18   :  { %165 = vmatpush3.msra.mxu0 %v20_v12 }
  0x19   :  { %166 = vmatprep.subr.mxu0 %v202_v1 }
  0x1a   :  { %167 = vmatpush3.msra.mxu0 %v19_v13 }
  0x1b   :  { %168 = vmatprep.subr.mxu0 %v202_v1 }
  0x1c   :  { %169 = vmatpush3.msra.mxu0 %v18_v14 }
  0x1d   :  { %170 = vmatprep.subr.mxu0 %v202_v1 }
  0x1e   :  { %171 = vmatpush3.msra.mxu0 %v17_v15 }
  0x1f   :  { %172 = vmatprep.subr.mxu0 %v202_v1 }
  0x20   :  { %173 = vmatpush3.msra.mxu0 %v16_v16 }
  0x21   :  { %175 = vmatmul.mubr.f32.vlgmr.msra.gmra.mxu0 %v15_v17 }
  0xe1   :  { %v105_v19 = vpop.f32.mrf.mxu0 }
  0xe2   :  { %v106_v20 = vadd.f32 %v124_v18, %v105_v19 }
  0xe3   :  { %v176_v21 = vpop.f32.mrf.mxu0 }
  0xe4   :  { %109 = vst [vmem:[#allocation2] sm:$0xff] %v106_v20 }
  0xe5   :  { %191 = shalt.err (!%p188_p4)
}
  0xe6   :  { %119 = dma.vmem_to_hbm [thread:$0]  %s117_s22, 128, %s285_s3, [#allocation3]  }
  0xe7   :  { %200 = dma.done.wait [#allocation3], 128  }
  0xe8   :  { %201 = vsyncadd [#allocation3], 4294967168 }
  0xe9   :  { %123 = vsyncpa [#allocation3], 1 }

</bundles_post_ra>
